<compile_context>
chip_gen: v5e
topology: v5e:2x2
jax: 0.10.0
libtpu: 0.0.40
codegen_flags: <defaults>
</compile_context>

<pallas_src>
import jax
import jax.numpy as jnp
from jax import lax
from jax.experimental import pallas as pl
from jax.experimental.pallas import tpu as pltpu


# ---------------------------------------------------------------------------
# Path 1: Linear(1, 1) — VPU broadcast FMA, weight/bias as SMEM scalars.
# ---------------------------------------------------------------------------
def _linear11_kernel(w_ref, b_ref, x_ref, o_ref):
    # w_ref, b_ref: (1,) f32 scalars in SMEM (no VMEM DMA, no double buffer).
    # x_ref, o_ref: (1, batch) in VMEM — batch sits on the lane axis, so the
    # store is a dense vst rather than a width-1 vst.msk.
    w = w_ref[0]
    b = b_ref[0]
    o_ref[...] = (x_ref[...].astype(jnp.float32) * w + b).astype(o_ref.dtype)


def _linear11_forward(x, weight, bias):
    batch = x.shape[0]
    x_row = x.reshape(1, batch)                      # contiguous metadata reshape
    w_s = weight.reshape(-1).astype(jnp.float32)     # (1,) scalar
    b_s = bias.reshape(-1).astype(jnp.float32)       # (1,) scalar

    out_row = pl.pallas_call(
        _linear11_kernel,
        out_shape=jax.ShapeDtypeStruct((1, batch), x.dtype),
        in_specs=[
            pl.BlockSpec(memory_space=pltpu.MemorySpace.SMEM),   # weight scalar
            pl.BlockSpec(memory_space=pltpu.MemorySpace.SMEM),   # bias scalar
            pl.BlockSpec((1, batch), lambda: (0, 0)),            # x, lane-dense
        ],
        out_specs=pl.BlockSpec((1, batch), lambda: (0, 0)),
        # Advisory cost hint so XLA does not mis-schedule around the tiny call.
        cost_estimate=pl.CostEstimate(
            flops=2 * batch,
            transcendentals=0,
            bytes_accessed=(2 * batch + 2) * 4,
        ),
    )(w_s, b_s, x_row)
    return out_row.reshape(batch, 1)


# ---------------------------------------------------------------------------
# Path 2: general Linear — tiled MXU matmul with f32 accumulator.
# ---------------------------------------------------------------------------
def _linear_tiled_kernel(x_ref, w_ref, b_ref, o_ref, acc_ref):
    # x_ref: (tm, tk); w_ref: (tn, tk) (PyTorch layout, contracted on dim 1);
    # b_ref: (1, tn);  o_ref: (tm, tn); acc_ref: (tm, tn) f32 VMEM scratch.
    k = pl.program_id(2)

    @pl.when(k == 0)
    def _():
        acc_ref[...] = jnp.zeros_like(acc_ref)

    acc_ref[...] += lax.dot_general(
        x_ref[...], w_ref[...],
        dimension_numbers=(((1,), (1,)), ((), ())),   # x @ w.T without a transpose op
        preferred_element_type=jnp.float32,
    )

    @pl.when(k == pl.num_programs(2) - 1)
    def _():
        o_ref[...] = (acc_ref[...] + b_ref[...].astype(jnp.float32)).astype(o_ref.dtype)


def _pick_tile(dim, preferred):
    # Use the preferred tile when it divides the dim; otherwise fall back to a
    # full-extent block (block_shape == array dim always satisfies the (8,128)
    # rule). Fine for the small/irregular shapes this model sees.
    return preferred if dim % preferred == 0 else dim


def _linear_tiled_forward(x, weight, bias, *, tm=256, tn=256, tk=512):
    M, K = x.shape
    N, _ = weight.shape
    tm, tn, tk = _pick_tile(M, tm), _pick_tile(N, tn), _pick_tile(K, tk)
    b2 = bias.reshape(1, N)

    # VMEM budget (f32 defaults): 2*(tm*tk + tn*tk + tn) + 2*tm*tn double-buffered
    # blocks + tm*tn accumulator ≈ 2.8 MiB — comfortably inside v7x's 32 MiB
    # scoped VMEM (and trivially inside v5e/v6e's 128 MiB).
    return pl.pallas_call(
        _linear_tiled_kernel,
        out_shape=jax.ShapeDtypeStruct((M, N), x.dtype),
        grid_spec=pltpu.PrefetchScalarGridSpec(
            num_scalar_prefetch=0,
            grid=(M // tm, N // tn, K // tk),
            in_specs=[
                pl.BlockSpec((tm, tk), lambda i, j, k: (i, k)),
                pl.BlockSpec((tn, tk), lambda i, j, k: (j, k)),
                pl.BlockSpec((1, tn), lambda i, j, k: (0, j)),
            ],
            out_specs=pl.BlockSpec((tm, tn), lambda i, j, k: (i, j)),
            scratch_shapes=[pltpu.VMEM((tm, tn), jnp.float32)],
        ),
        compiler_params=pltpu.CompilerParams(
            dimension_semantics=("parallel", "parallel", "arbitrary"),
        ),
        cost_estimate=pl.CostEstimate(
            flops=2 * M * N * K,
            transcendentals=0,
            bytes_accessed=(M * K + N * K + N + M * N) * x.dtype.itemsize,
        ),
    )(x, weight, b2)


# ---------------------------------------------------------------------------
# Public forward: y = x @ weight.T + bias (same math as torch.nn.Linear).
# ---------------------------------------------------------------------------
def linmodel2_forward(x, weight, bias):
    out_f, in_f = weight.shape
    if in_f == 1 and out_f == 1:
        return _linear11_forward(x, weight, bias)
    return _linear_tiled_forward(x, weight, bias)


if __name__ == "__main__":
    key = jax.random.PRNGKey(0)
    k_x, k_w, k_b, k_x2, k_w2, k_b2 = jax.random.split(key, 6)

    # --- The literal linmodel2 configuration: Linear(1, 1), batch of 8. ---
    input_size, output_size, batch = 1, 1, 8
    weight = jax.random.uniform(k_w, (output_size, input_size), jnp.float32,
                                minval=-1.0, maxval=1.0)
    bias = jax.random.uniform(k_b, (output_size,), jnp.float32,
                              minval=-1.0, maxval=1.0)
    x = jax.random.normal(k_x, (batch, input_size), jnp.float32)

    out = jax.block_until_ready(linmodel2_forward(x, weight, bias))
    ref = x @ weight.T + bias
    assert out.shape == (batch, output_size)
    assert jnp.allclose(out, ref, atol=1e-5, rtol=1e-5)

    # --- Sanity-check the general tiled MXU path at a non-trivial Linear. ---
    M, K, N = 512, 1024, 512
    x2 = jax.random.normal(k_x2, (M, K), jnp.float32)
    w2 = jax.random.normal(k_w2, (N, K), jnp.float32) * 0.05
    b2 = jax.random.normal(k_b2, (N,), jnp.float32)
    out2 = jax.block_until_ready(linmodel2_forward(x2, w2, b2))
    ref2 = jnp.dot(x2, w2.T, precision=lax.Precision.HIGHEST) + b2
    assert out2.shape == (M, N)
    assert jnp.allclose(out2, ref2, atol=5e-2, rtol=5e-2)

    print("KERNEL_OK")
</pallas_src>

<mosaic_0001>
module attributes {stable_mosaic.version = 11 : i64} {
  func.func @_linear11_kernel(%arg0: memref<1xf32, #tpu.memory_space<smem>>, %arg1: memref<1xf32, #tpu.memory_space<smem>>, %arg2: memref<1x8xf32, #tpu.memory_space<vmem>>, %arg3: memref<1x8xf32, #tpu.memory_space<vmem>>) attributes {dimension_semantics = [], scalar_prefetch = 0 : i64, scratch_operands = 0 : i64, tpu.core_type = #tpu.core_type<tc>} {
    %c0 = arith.constant 0 : index
    %0 = memref.load %arg0[%c0] : memref<1xf32, #tpu.memory_space<smem>>
    %c0_0 = arith.constant 0 : index
    %1 = memref.load %arg1[%c0_0] : memref<1xf32, #tpu.memory_space<smem>>
    %c0_1 = arith.constant 0 : index
    %c0_2 = arith.constant 0 : index
    %2 = vector.load %arg2[%c0_1, %c0_2] : memref<1x8xf32, #tpu.memory_space<vmem>>, vector<1x8xf32>
    %3 = vector.broadcast %0 : f32 to vector<1x8xf32>
    %4 = arith.mulf %2, %3 : vector<1x8xf32>
    %5 = vector.broadcast %1 : f32 to vector<1x8xf32>
    %6 = arith.addf %4, %5 : vector<1x8xf32>
    %c0_3 = arith.constant 0 : index
    %c0_4 = arith.constant 0 : index
    %7 = vector.load %arg3[%c0_3, %c0_4] : memref<1x8xf32, #tpu.memory_space<vmem>>, vector<1x8xf32>
    tpu.vector_store %arg3[%c0_3, %c0_4], %6 {strides = array<i32>} : memref<1x8xf32, #tpu.memory_space<vmem>>, vector<1x8xf32>,
    return
  }
}

</mosaic_0001>

<bundles_post_ra>
// kernel: tpu_custom_call.1
= control target key start
LH: loop header
LB: loop body
LE: loop exit
PB: predicated region body
PF: predicated region fallthrough
CT: control target
= control target key end

     0   :  { %s102_s0 = inlined_call_operand.<no memory space> [shape: f32[1], index: 0, kind: input, shape index: {}]   ;;  %s103_s1 = inlined_call_operand.<no memory space> [shape: f32[1], index: 1, kind: input, shape index: {}]   ;;  %s104_s2 = inlined_call_operand.vmem [shape: f32[1,8], index: 2, kind: input, shape index: {}]   ;;  %s105_s3 = inlined_call_operand.hbm [shape: f32[1,8], index: 3, kind: output, shape index: {}]  }
   0x1   :  { %v19_v0 = vld [vmem:[%s104_s2] sm:$0x1]  ;;  %v20_v1 = vstv %s102_s0  ;;  %v22_v2 = vstv %s103_s1 }
   0x2   :  { %10 = vsyncpa [#allocation5], 0  ;;  %v21_v3 = vmul.f32 %v20_v1, %v19_v0  ;;  %s69_s18 = smov [#allocation4]   ;;  %s33_s22 = sshll.u32 %s105_s3, 4  ;;  %vm24_vm0 = vcmask 57344   ;;  %s34_s22 = int_to_ptr.hbm [resolvable:$true] %s33_s22 }
   0x3   :  { %s31_s19 = sshll.u32 %s69_s18, 4  ;;  %s32_s19 = int_to_ptr.vmem [resolvable:$true] %s31_s19 }
   0x4   :  { %v23_v4 = vadd.f32 %v22_v2, %v21_v3 }
   0x6   :  { %25 = vst.msk [vmem:[#allocation4] sm:$0x1] %vm24_vm0, %v23_v4 }
   0x7   :  { %36 = dma.vmem_to_hbm [thread:$0]  %s32_s19, 16, %s34_s22, [#allocation5]  }
   0x8   :  { %67 = dma.done.wait [#allocation5], 16  }
   0x9   :  { %68 = vsyncadd [#allocation5], 4294967280 }
   0xa   :  { %41 = vsyncpa [#allocation5], 1 }

</bundles_post_ra>
